<compile_context>
chip_gen: v7x
topology: tpu7x:2x2x1
jax: 0.10.0
libtpu: 0.0.40
codegen_flags: <defaults>
</compile_context>

<pallas_src>
import functools

import jax
import jax.numpy as jnp
import numpy as np
from jax.experimental import pallas as pl
from jax.experimental.pallas import tpu as pltpu

LANES = 128
SUBLANES = 8
_VMEM_BUDGET = 12 * 1024 * 1024   # conservative: inside every gen's scoped default
_TB_CAP = 2048                    # upper bound on the batch tile


def _round_up(x, m):
    return ((x + m - 1) // m) * m


def _choose_batch_tile(B, H, LP, in_itemsize):
    """Largest batch tile whose double-buffered working set fits the budget."""
    resident = 2 * (H * LP * in_itemsize + LP * 4)        # weight + bias buffers
    per_row = 2 * (H * in_itemsize + LP * 4)              # cls tile + logits tile
    tb = min(_round_up(max(B, 1), SUBLANES), _TB_CAP)
    while tb > SUBLANES and resident + per_row * tb > _VMEM_BUDGET:
        tb = _round_up(tb // 2, SUBLANES)
    return max(tb, SUBLANES)


# ----------------------------- kernels --------------------------------------
def _head_logits(cls_ref, w_ref, b_ref):
    # ClassificationHead: logits = cls @ W^T + b   (f32 accumulation on the MXU)
    logits = jnp.dot(cls_ref[...], w_ref[...], preferred_element_type=jnp.float32)
    return logits + b_ref[...].astype(jnp.float32)


def logits_kernel(cls_ref, w_ref, b_ref, out_ref):
    out_ref[...] = _head_logits(cls_ref, w_ref, b_ref).astype(out_ref.dtype)


def logits_loss_kernel(num_labels, batch_size,
                       cls_ref, w_ref, b_ref, labels_ref,
                       logits_ref, loss_ref,
                       sum_ref, cnt_ref):
    i = pl.program_id(0)

    @pl.when(i == 0)
    def _():
        sum_ref[0] = jnp.float32(0.0)
        cnt_ref[0] = jnp.float32(0.0)

    logits = _head_logits(cls_ref, w_ref, b_ref)            # f32 [TB, LP]
    logits_ref[...] = logits.astype(logits_ref.dtype)

    TB, LP = logits.shape
    class_ids = jax.lax.broadcasted_iota(jnp.int32, (TB, LP), 1)
    lane_valid = class_ids < num_labels                      # mask padded lanes

    labels = labels_ref[...]                                 # [TB, 1] int32
    row_ids = i * TB + jax.lax.broadcasted_iota(jnp.int32, (TB, 1), 0)
    # boundary-block rows (>= batch_size) and ignore_index (-100) rows are
    # excluded from both the numerator and the divisor.
    row_valid = (row_ids < batch_size) & (labels >= 0)

    # nn.CrossEntropyLoss (integer labels, mean over valid rows):
    #   loss_b = logsumexp(logits_b[:L]) - logits_b[label_b]
    masked = jnp.where(lane_valid, logits, -jnp.inf)
    m = jnp.max(masked, axis=-1, keepdims=True)
    lse = m + jnp.log(jnp.sum(jnp.exp(masked - m), axis=-1, keepdims=True))
    picked = jnp.sum(jnp.where(class_ids == labels, logits, 0.0),
                     axis=-1, keepdims=True)
    per_row = jnp.where(row_valid, lse - picked, 0.0)        # [TB, 1]

    sum_ref[0] += jnp.sum(per_row)
    cnt_ref[0] += jnp.sum(row_valid.astype(jnp.float32))

    @pl.when(i == pl.num_programs(0) - 1)
    def _():
        loss_ref[0, 0] = sum_ref[0] / cnt_ref[0]


# ----------------------------- wrappers --------------------------------------
def prepare_classifier_params(cls_weight, cls_bias, lanes=LANES):
    """One-time parameter preprocessing (transpose + lane padding).

    cls_weight : [L, H] (PyTorch nn.Linear layout)  -> w_t : [H, LP]
    cls_bias   : [L]                                -> b   : [1, LP]
    Padded columns are zero; they are masked / sliced away downstream.
    """
    L, H = cls_weight.shape
    LP = _round_up(L, lanes)
    w_t = jnp.zeros((H, LP), cls_weight.dtype).at[:, :L].set(cls_weight.T)
    b = jnp.zeros((1, LP), cls_bias.dtype).at[0, :L].set(cls_bias)
    return w_t, b, L


def classify_from_hidden_states(hidden_states, w_t, b, num_labels,
                                labels=None, batch_tile=None):
    """Pallas equivalent of: select_cls -> ClassificationHead -> optional CE loss.

    hidden_states : [B, S, H] (backbone last_hidden_state, f32 or bf16)
    w_t           : [H, LP]   (pre-transposed, lane-padded weight)
    b             : [1, LP]   (lane-padded bias)
    labels        : [B] int   (optional; ignore_index = -100 honored)
    """
    B, S, H = hidden_states.shape
    LP = w_t.shape[1]
    itemsize = jnp.dtype(hidden_states.dtype).itemsize

    # Fused CLS gather: view [B, S, H] as [B, S*H] (free contiguous reshape);
    # the BlockSpec below fetches columns [0:H] of each row == hs[:, 0, :],
    # so the strided row-0 gather happens inside the pipeline DMA.
    if H % LANES == 0:
        src = hidden_states.reshape(B, S * H)
    else:
        # TODO(synk): lane-unaligned hidden_size falls back to a wrapper slice.
        src = hidden_states[:, 0, :]

    if batch_tile is None:
        tb = _choose_batch_tile(B, H, LP, itemsize)
    else:
        tb = max(SUBLANES, _round_up(batch_tile, SUBLANES))
    grid = (pl.cdiv(B, tb),)

    src_spec = pl.BlockSpec((tb, H), lambda i: (i, 0))
    w_spec = pl.BlockSpec((H, LP), lambda i: (0, 0))        # resident weight
    b_spec = pl.BlockSpec((1, LP), lambda i: (0, 0))
    out_spec = pl.BlockSpec((tb, LP), lambda i: (i, 0))

    base_bytes = B * H * itemsize + H * LP * itemsize + LP * 4 + B * LP * 4

    if labels is None:
        cost = pl.CostEstimate(flops=2 * B * H * LP, transcendentals=0,
                               bytes_accessed=base_bytes)
        logits_p = pl.pallas_call(
            logits_kernel,
            out_shape=jax.ShapeDtypeStruct((B, LP), jnp.float32),
            grid=grid,
            in_specs=[src_spec, w_spec, b_spec],
            out_specs=out_spec,
            compiler_params=pltpu.CompilerParams(
                dimension_semantics=("parallel",)),
            cost_estimate=cost,
        )(src, w_t, b)
        return dict(loss=None, logits=logits_p[:, :num_labels])

    labels2d = labels.astype(jnp.int32).reshape(B, 1)
    lbl_spec = pl.BlockSpec((tb, 1), lambda i: (i, 0))
    loss_spec = pl.BlockSpec((1, 1), lambda i: (0, 0),
                             memory_space=pltpu.MemorySpace.SMEM)
    cost = pl.CostEstimate(flops=2 * B * H * LP + 10 * B * LP,
                           transcendentals=B * LP + B,
                           bytes_accessed=base_bytes + B * 4)
    logits_p, loss = pl.pallas_call(
        functools.partial(logits_loss_kernel, num_labels, B),
        out_shape=(jax.ShapeDtypeStruct((B, LP), jnp.float32),
                   jax.ShapeDtypeStruct((1, 1), jnp.float32)),
        grid=grid,
        in_specs=[src_spec, w_spec, b_spec, lbl_spec],
        out_specs=(out_spec, loss_spec),
        scratch_shapes=[pltpu.SMEM((1,), jnp.float32),
                        pltpu.SMEM((1,), jnp.float32)],
        compiler_params=pltpu.CompilerParams(
            dimension_semantics=("arbitrary",)),
        cost_estimate=cost,
    )(src, w_t, b, labels2d)
    return dict(loss=loss[0, 0], logits=logits_p[:, :num_labels])


def synthetic_backbone(input_ids, embed_table):
    """Deterministic stand-in for the external backbone (plain-JAX glue)."""
    # TODO(synk): real BERT backbone (attention/FFN stack) not reproduced.
    return jnp.tanh(embed_table[input_ids])


def model_for_token_classification(input_ids, attention_mask, embed_table,
                                   w_t, b, num_labels,
                                   token_type_ids=None, labels=None,
                                   batch_tile=None):
    del attention_mask, token_type_ids  # consumed by the (synthetic) backbone
    hidden_states = synthetic_backbone(input_ids, embed_table)
    return classify_from_hidden_states(hidden_states, w_t, b, num_labels,
                                       labels=labels, batch_tile=batch_tile)


# ----------------------------- demo ------------------------------------------
if __name__ == "__main__":
    # ---- small config (H kept lane-aligned so the fused CLS gather path runs)
    B, S, H, L, VOCAB = 2, 8, 128, 8, 50

    key = jax.random.PRNGKey(0)
    k_emb, k_w, k_b, k_ids, k_lab, k_ids2, k_lab2 = jax.random.split(key, 7)

    embed_table = jax.random.normal(k_emb, (VOCAB, H), dtype=jnp.float32) * 0.1
    cls_weight = jax.random.normal(k_w, (L, H), dtype=jnp.float32) * 0.05
    cls_bias = jax.random.normal(k_b, (L,), dtype=jnp.float32) * 0.01

    # One-time parameter preprocessing (transpose + lane padding).
    w_t, b_pad, num_labels = prepare_classifier_params(cls_weight, cls_bias)

    def reference(input_ids, labels=None):
        hs = synthetic_backbone(input_ids, embed_table)
        cls = hs[:, 0, :]
        logits = cls @ cls_weight.T + cls_bias
        loss = None
        if labels is not None:
            valid = labels >= 0
            lse = jax.scipy.special.logsumexp(logits, axis=-1)
            safe = jnp.where(valid, labels, 0)
            picked = logits[jnp.arange(logits.shape[0]), safe]
            loss = jnp.sum(jnp.where(valid, lse - picked, 0.0)) / jnp.sum(valid)
        return logits, loss

    # ---- test 1: tiny batch, with and without labels -------------------------
    input_ids = jax.random.randint(k_ids, (B, S), 0, VOCAB, dtype=jnp.int32)
    attention_mask = jnp.ones((B, S), dtype=jnp.int32)
    labels = jax.random.randint(k_lab, (B,), 0, L, dtype=jnp.int32)

    out = model_for_token_classification(
        input_ids, attention_mask, embed_table, w_t, b_pad, num_labels,
        labels=labels)
    out_no_loss = model_for_token_classification(
        input_ids, attention_mask, embed_table, w_t, b_pad, num_labels)
    jax.block_until_ready((out["logits"], out["loss"], out_no_loss["logits"]))

    logits_ref, loss_ref = reference(input_ids, labels)
    assert out["logits"].shape == (B, L)
    assert out_no_loss["loss"] is None
    assert np.allclose(np.asarray(out["logits"]), np.asarray(logits_ref),
                       rtol=1e-5, atol=1e-5)
    assert np.allclose(np.asarray(out_no_loss["logits"]), np.asarray(logits_ref),
                       rtol=1e-5, atol=1e-5)
    assert np.allclose(float(out["loss"]), float(loss_ref), rtol=1e-5, atol=1e-5)

    # ---- test 2: ragged batch (B2 % tile != 0), multi-step grid, ignore_index
    B2 = 10
    input_ids2 = jax.random.randint(k_ids2, (B2, S), 0, VOCAB, dtype=jnp.int32)
    attention_mask2 = jnp.ones((B2, S), dtype=jnp.int32)
    labels2 = jax.random.randint(k_lab2, (B2,), 0, L, dtype=jnp.int32)
    labels2 = labels2.at[3].set(-100).at[7].set(-100)   # ignore_index rows

    out2 = model_for_token_classification(
        input_ids2, attention_mask2, embed_table, w_t, b_pad, num_labels,
        labels=labels2, batch_tile=8)
    out2_no_loss = model_for_token_classification(
        input_ids2, attention_mask2, embed_table, w_t, b_pad, num_labels,
        batch_tile=8)
    jax.block_until_ready((out2["logits"], out2["loss"], out2_no_loss["logits"]))

    logits_ref2, loss_ref2 = reference(input_ids2, labels2)
    assert out2["logits"].shape == (B2, L)
    assert np.allclose(np.asarray(out2["logits"]), np.asarray(logits_ref2),
                       rtol=1e-5, atol=1e-5)
    assert np.allclose(np.asarray(out2_no_loss["logits"]), np.asarray(logits_ref2),
                       rtol=1e-5, atol=1e-5)
    assert np.allclose(float(out2["loss"]), float(loss_ref2), rtol=1e-5, atol=1e-5)

    print("KERNEL_OK")
</pallas_src>

<mosaic_0001>
module attributes {stable_mosaic.version = 11 : i64} {
  func.func @logits_loss_kernel(%arg0: i32, %arg1: memref<8x128xf32, #tpu.memory_space<vmem>>, %arg2: memref<128x128xf32, #tpu.memory_space<vmem>>, %arg3: memref<1x128xf32, #tpu.memory_space<vmem>>, %arg4: memref<8x1xi32, #tpu.memory_space<vmem>>, %arg5: memref<8x128xf32, #tpu.memory_space<vmem>>, %arg6: memref<1x1xf32, #tpu.memory_space<smem>>, %arg7: memref<1xf32, #tpu.memory_space<smem>>, %arg8: memref<1xf32, #tpu.memory_space<smem>>) attributes {dimension_semantics = [#tpu.dimension_semantics<arbitrary>], iteration_bounds = array<i64: 1>, scalar_prefetch = 0 : i64, scratch_operands = 2 : i64, tpu.core_type = #tpu.core_type<tc>, window_params = [{transform_indices = @transform_0, window_bounds = array<i64: 8, 128>}, {pipeline_mode = #tpu.pipeline_mode<synchronous>, transform_indices = @transform_1, window_bounds = array<i64: 128, 128>}, {pipeline_mode = #tpu.pipeline_mode<synchronous>, transform_indices = @transform_2, window_bounds = array<i64: 1, 128>}, {transform_indices = @transform_3, window_bounds = array<i64: 8, 1>}, {transform_indices = @transform_4, window_bounds = array<i64: 8, 128>}, {transform_indices = @transform_5, window_bounds = array<i64: 1, 1>}]} {
    %c0_i32 = arith.constant 0 : i32
    %0 = arith.cmpi eq, %arg0, %c0_i32 : i32
    %1 = arith.extui %0 : i1 to i32
    %c0_i32_0 = arith.constant 0 : i32
    %2 = arith.cmpi ne, %1, %c0_i32_0 : i32
    scf.if %2 {
      %cst_26 = arith.constant 0.000000e+00 : f32
      %c0_27 = arith.constant 0 : index
      %62 = memref.load %arg7[%c0_27] : memref<1xf32, #tpu.memory_space<smem>>
      memref.store %cst_26, %arg7[%c0_27] : memref<1xf32, #tpu.memory_space<smem>>
      %cst_28 = arith.constant 0.000000e+00 : f32
      %c0_29 = arith.constant 0 : index
      %63 = memref.load %arg8[%c0_29] : memref<1xf32, #tpu.memory_space<smem>>
      memref.store %cst_28, %arg8[%c0_29] : memref<1xf32, #tpu.memory_space<smem>>
    } else {
    }
    %c0 = arith.constant 0 : index
    %c0_1 = arith.constant 0 : index
    %3 = vector.load %arg1[%c0, %c0_1] : memref<8x128xf32, #tpu.memory_space<vmem>>, vector<8x128xf32>
    %c0_2 = arith.constant 0 : index
    %c0_3 = arith.constant 0 : index
    %4 = vector.load %arg2[%c0_2, %c0_3] : memref<128x128xf32, #tpu.memory_space<vmem>>, vector<128x128xf32>
    %cst = arith.constant dense<0.000000e+00> : vector<8x128xf32>
    %5 = tpu.matmul %3, %4, %cst {dimension_numbers = #tpu.dot_dimension_numbers<[1], [0], [0], [1], [0, 0, 1, 1], [], []>} : vector<8x128xf32>, vector<128x128xf32>, vector<8x128xf32> -> vector<8x128xf32>
    %c0_4 = arith.constant 0 : index
    %c0_5 = arith.constant 0 : index
    %6 = vector.load %arg3[%c0_4, %c0_5] : memref<1x128xf32, #tpu.memory_space<vmem>>, vector<1x128xf32>
    %7 = vector.broadcast %6 : vector<1x128xf32> to vector<8x128xf32>
    %8 = arith.addf %5, %7 : vector<8x128xf32>
    %c0_6 = arith.constant 0 : index
    %c0_7 = arith.constant 0 : index
    %9 = vector.load %arg5[%c0_6, %c0_7] : memref<8x128xf32, #tpu.memory_space<vmem>>, vector<8x128xf32>
    tpu.vector_store %arg5[%c0_6, %c0_7], %8 {strides = array<i32>} : memref<8x128xf32, #tpu.memory_space<vmem>>, vector<8x128xf32>,
    %10 = tpu.iota {dimensions = array<i32: 1>} : vector<8x128xi32>
    %c8_i32 = arith.constant 8 : i32
    %11 = vector.broadcast %c8_i32 : i32 to vector<8x128xi32>
    %12 = arith.cmpi slt, %10, %11 : vector<8x128xi32>
    %c0_8 = arith.constant 0 : index
    %c0_9 = arith.constant 0 : index
    %13 = vector.load %arg4[%c0_8, %c0_9] : memref<8x1xi32, #tpu.memory_space<vmem>>, vector<8x1xi32>
    %c8_i32_10 = arith.constant 8 : i32
    %14 = arith.muli %arg0, %c8_i32_10 : i32
    %15 = tpu.iota {dimensions = array<i32: 0>} : vector<8x1xi32>
    %16 = vector.broadcast %14 : i32 to vector<8x1xi32>
    %17 = arith.addi %16, %15 : vector<8x1xi32>
    %c2_i32 = arith.constant 2 : i32
    %18 = vector.broadcast %c2_i32 : i32 to vector<8x1xi32>
    %19 = arith.cmpi slt, %17, %18 : vector<8x1xi32>
    %c0_i32_11 = arith.constant 0 : i32
    %20 = vector.broadcast %c0_i32_11 : i32 to vector<8x1xi32>
    %21 = arith.cmpi sge, %13, %20 : vector<8x1xi32>
    %22 = arith.andi %19, %21 : vector<8x1xi1>
    %cst_12 = arith.constant 0xFF800000 : f32
    %23 = vector.broadcast %cst_12 : f32 to vector<8x128xf32>
    %24 = arith.select %12, %8, %23 : vector<8x128xi1>, vector<8x128xf32>
    %cst_13 = arith.constant dense<0xFF800000> : vector<8xf32>
    %25 = vector.multi_reduction <maximumf>, %24, %cst_13 [1] : vector<8x128xf32> to vector<8xf32>
    %26 = vector.shape_cast %25 : vector<8xf32> to vector<8x1xf32>
    %27 = vector.broadcast %26 : vector<8x1xf32> to vector<8x128xf32>
    %28 = arith.subf %24, %27 : vector<8x128xf32>
    %29 = math.exp %28 : vector<8x128xf32>
    %cst_14 = arith.constant dense<0.000000e+00> : vector<8xf32>
    %30 = vector.multi_reduction <add>, %29, %cst_14 [1] : vector<8x128xf32> to vector<8xf32>
    %31 = vector.shape_cast %30 : vector<8xf32> to vector<8x1xf32>
    %32 = math.log %31 : vector<8x1xf32>
    %33 = arith.addf %26, %32 : vector<8x1xf32>
    %34 = vector.broadcast %13 : vector<8x1xi32> to vector<8x128xi32>
    %35 = arith.cmpi eq, %10, %34 : vector<8x128xi32>
    %cst_15 = arith.constant 0.000000e+00 : f32
    %36 = vector.broadcast %cst_15 : f32 to vector<8x128xf32>
    %37 = arith.select %35, %8, %36 : vector<8x128xi1>, vector<8x128xf32>
    %cst_16 = arith.constant dense<0.000000e+00> : vector<8xf32>
    %38 = vector.multi_reduction <add>, %37, %cst_16 [1] : vector<8x128xf32> to vector<8xf32>
    %39 = vector.shape_cast %38 : vector<8xf32> to vector<8x1xf32>
    %40 = arith.subf %33, %39 : vector<8x1xf32>
    %cst_17 = arith.constant 0.000000e+00 : f32
    %41 = vector.broadcast %cst_17 : f32 to vector<8x1xf32>
    %42 = arith.select %22, %40, %41 : vector<8x1xi1>, vector<8x1xf32>
    %c0_18 = arith.constant 0 : index
    %43 = memref.load %arg7[%c0_18] : memref<1xf32, #tpu.memory_space<smem>>
    %44 = vector.shape_cast %42 : vector<8x1xf32> to vector<1x8x1xf32>
    %cst_19 = arith.constant dense<0.000000e+00> : vector<1xf32>
    %45 = vector.multi_reduction <add>, %44, %cst_19 [1, 2] : vector<1x8x1xf32> to vector<1xf32>
    %46 = vector.shape_cast %45 : vector<1xf32> to vector<1x1x1xf32>
    %47 = vector.extract %46[0, 0, 0] : f32 from vector<1x1x1xf32>
    %48 = arith.addf %43, %47 : f32
    %c0_20 = arith.constant 0 : index
    %49 = memref.load %arg7[%c0_20] : memref<1xf32, #tpu.memory_space<smem>>
    memref.store %48, %arg7[%c0_20] : memref<1xf32, #tpu.memory_space<smem>>
    %c0_21 = arith.constant 0 : index
    %50 = memref.load %arg8[%c0_21] : memref<1xf32, #tpu.memory_space<smem>>
    %51 = arith.extui %22 : vector<8x1xi1> to vector<8x1xi32>
    %52 = arith.sitofp %51 : vector<8x1xi32> to vector<8x1xf32>
    %53 = vector.shape_cast %52 : vector<8x1xf32> to vector<1x8x1xf32>
    %cst_22 = arith.constant dense<0.000000e+00> : vector<1xf32>
    %54 = vector.multi_reduction <add>, %53, %cst_22 [1, 2] : vector<1x8x1xf32> to vector<1xf32>
    %55 = vector.shape_cast %54 : vector<1xf32> to vector<1x1x1xf32>
    %56 = vector.extract %55[0, 0, 0] : f32 from vector<1x1x1xf32>
    %57 = arith.addf %50, %56 : f32
    %c0_23 = arith.constant 0 : index
    %58 = memref.load %arg8[%c0_23] : memref<1xf32, #tpu.memory_space<smem>>
    memref.store %57, %arg8[%c0_23] : memref<1xf32, #tpu.memory_space<smem>>
    %c0_i32_24 = arith.constant 0 : i32
    %59 = arith.cmpi eq, %arg0, %c0_i32_24 : i32
    %60 = arith.extui %59 : i1 to i32
    %c0_i32_25 = arith.constant 0 : i32
    %61 = arith.cmpi ne, %60, %c0_i32_25 : i32
    scf.if %61 {
      %c0_26 = arith.constant 0 : index
      %62 = memref.load %arg7[%c0_26] : memref<1xf32, #tpu.memory_space<smem>>
      %c0_27 = arith.constant 0 : index
      %63 = memref.load %arg8[%c0_27] : memref<1xf32, #tpu.memory_space<smem>>
      %64 = arith.divf %62, %63 : f32
      %c0_28 = arith.constant 0 : index
      %c0_29 = arith.constant 0 : index
      %65 = memref.load %arg6[%c0_28, %c0_29] : memref<1x1xf32, #tpu.memory_space<smem>>
      memref.store %64, %arg6[%c0_28, %c0_29] : memref<1x1xf32, #tpu.memory_space<smem>>
    } else {
    }
    return
  }
  func.func @transform_0(%arg0: i32) -> (i32, i32) {
    %c0_i32 = arith.constant 0 : i32
    %c0_i32_0 = arith.constant 0 : i32
    return %arg0, %c0_i32 : i32, i32
  }
  func.func @transform_1(%arg0: i32) -> (i32, i32) {
    %c0_i32 = arith.constant 0 : i32
    %c0_i32_0 = arith.constant 0 : i32
    %c0_i32_1 = arith.constant 0 : i32
    return %c0_i32, %c0_i32_0 : i32, i32
  }
  func.func @transform_2(%arg0: i32) -> (i32, i32) {
    %c0_i32 = arith.constant 0 : i32
    %c0_i32_0 = arith.constant 0 : i32
    %c0_i32_1 = arith.constant 0 : i32
    return %c0_i32, %c0_i32_0 : i32, i32
  }
  func.func @transform_3(%arg0: i32) -> (i32, i32) {
    %c0_i32 = arith.constant 0 : i32
    %c0_i32_0 = arith.constant 0 : i32
    return %arg0, %c0_i32 : i32, i32
  }
  func.func @transform_4(%arg0: i32) -> (i32, i32) {
    %c0_i32 = arith.constant 0 : i32
    %c0_i32_0 = arith.constant 0 : i32
    return %arg0, %c0_i32 : i32, i32
  }
  func.func @transform_5(%arg0: i32) -> (i32, i32) {
    %c0_i32 = arith.constant 0 : i32
    %c0_i32_0 = arith.constant 0 : i32
    %c0_i32_1 = arith.constant 0 : i32
    return %c0_i32, %c0_i32_0 : i32, i32
  }
}

</mosaic_0001>

<bundles_post_ra>
// kernel: tpu_custom_call.1
= control target key start
LH: loop header
LB: loop body
LE: loop exit
PB: predicated region body
PF: predicated region fallthrough
CT: control target
= control target key end

     0   :  { %11 = vsyncpa [#allocation5], 0  ;;  %s552_s0 = inlined_call_operand.hbm [shape: f32[2,1024], index: 0, kind: input, shape index: {}]   ;;  %s553_s1 = inlined_call_operand.hbm [shape: f32[128,128], index: 1, kind: input, shape index: {}]   ;;  %s554_s2 = inlined_call_operand.vmem [shape: f32[1,128], index: 2, kind: input, shape index: {}]   ;;  %s555_s3 = inlined_call_operand.vmem [shape: s32[2,1], index: 3, kind: input, shape index: {}]   ;;  %s556_s4 = inlined_call_operand.hbm [shape: f32[2,128], index: 4, kind: output, shape index: {0}]   ;;  %s557_s5 = inlined_call_operand.hbm [shape: f32[1,1], index: 5, kind: output, shape index: {1}]  }
   0x1   :  { %12 = vsyncpa [#allocation9], 0 }
   0x2   :  { %13 = vsyncpa [#allocation6], 0 }
   0x3   :  { %14 = vsyncpa [#allocation7], 0 }
   0x4   :  { %19 = vsyncadd [#allocation5], 96  ;;  %s445_s18 = smov [#allocation4]   ;;  %s361_s22 = scalar_lea.hbm %s552_s0, 32 }
   0x5   :  { %s20_s19 = sshll.u32 %s445_s18, 4  ;;  %p362_p0 = scmp.ne.s32.totalorder %s552_s0, %s361_s22  ;;  %s21_s19 = int_to_ptr.vmem [resolvable:$true] %s20_s19 }
   0x6   :  { %s363_s27 = scalar_lea.hbm %s552_s0, 256  ;;  %p365_p2 = scmp.lt.u32.totalorder %s361_s22, %s552_s0 }
   0x7   :  { %p364_p1 = scmp.lt.u32.totalorder %s363_s27, %s361_s22 }
   0x9   :  { %p366_p3 = por %p365_p2, %p364_p1 }
   0xb   :  { %p367_p4 = pnand %p366_p3, %p362_p0 }
   0xd   :  { %370 = shalt.err (!%p367_p4)
}
   0xe   :  { %s371_s30 = scalar_lea.vmem %s21_s19, 32  ;;  %s375_s6 = scalar_lea.vmem %s21_s19, 128 }
   0xf   :  { %p372_p5 = scmp.ne.s32.totalorder %s21_s19, %s371_s30  ;;  %p376_p6 = scmp.lt.s32.totalorder %s21_s19, %s21_s19 }
  0x10   :  { %p377_p7 = scmp.lt.s32.totalorder %s375_s6, %s371_s30 }
  0x12   :  { %p378_p8 = por %p377_p7, %p376_p6 }
  0x14   :  { %p379_p9 = pnand %p378_p8, %p372_p5 }
  0x16   :  { %382 = shalt.err (!%p379_p9)
}
  0x17   :  { %s446_s7 = smov 256   ;;  %s447_s8 = smov 32  }
  0x18   :  { %s448_s9 = smov 2   ;;  %s449_s12 = smov [#allocation8]  }
  0x19   :  { %26 = dma.hbm_to_vmem [thread:$0]  %s552_s0, 32, %s21_s19, [#allocation5], %s446_s7, %s447_s8, %s448_s9  }
  0x1a   :  { %s32_s13 = sshll.u32 %s449_s12, 4  ;;  %s383_s16 = scalar_lea.hbm %s553_s1, 2048  ;;  %s33_s13 = int_to_ptr.vmem [resolvable:$true] %s32_s13 }
  0x1b   :  { %p384_p10 = scmp.ne.s32.totalorder %s553_s1, %s383_s16  ;;  %p387_p11 = scmp.lt.u32.totalorder %s383_s16, %s553_s1 }
  0x1d   :  { %p389_p12 = pnand %p387_p11, %p384_p10 }
  0x1f   :  { %392 = shalt.err (!%p389_p12)
}
  0x20   :  { %s393_s22 = scalar_lea.vmem %s33_s13, 2048  ;;  %p398_p0 = scmp.lt.s32.totalorder %s33_s13, %s33_s13 }
  0x21   :  { %p394_p13 = scmp.ne.s32.totalorder %s33_s13, %s393_s22  ;;  %p399_p1 = scmp.lt.s32.totalorder %s393_s22, %s393_s22 }
  0x23   :  { %p400_p2 = por %p399_p1, %p398_p0 }
  0x25   :  { %p401_p3 = pnand %p400_p2, %p394_p13 }
  0x27   :  { %404 = shalt.err (!%p401_p3)
}
  0x28   :  { %s450_s0 = smov 128   ;;  %s451_s19 = smov 8  }
  0x29   :  { %38 = dma.hbm_to_vmem [thread:$0]  %s553_s1, 2048, %s33_s13, [#allocation9], %s450_s0, %s450_s0, %s451_s19  }
  0x2a   :  { %437 = dma.done.wait [#allocation5], 128  }
  0x2b   :  { %438 = vsyncadd [#allocation5], 4294967168 }
  0x2c   :  { %439 = dma.done.wait [#allocation9], 2048  }
  0x2d   :  { %440 = vsyncadd [#allocation9], 4294965248  ;;  %v452_v0 = vmov 0.0|0.0   ;;  %vm453_vm0 = vmmov 0   ;;  %v454_v1 = vmov 0.0   ;;  %v58_v2 = vld [vmem:[#allocation8] sm:$0xff]  ;;  %v152_v28 = vlaneseq }
  0x2e   :  { %311 = vmatprep.subr.bf16.mxu0 %v452_v0  ;;  %308 = vmatprep.mubr.msk.f32.mxu0 %vm453_vm0, %v454_v1  ;;  %v59_v3 = vld [vmem:[#allocation8 + $0x8] sm:$0xff]  ;;  %v60_v4 = vld [vmem:[#allocation8 + $0x10] sm:$0xff]  ;;  %v61_v6 = vld [vmem:[#allocation8 + $0x18] sm:$0xff]  ;;  %v455_v27 = vmov 0   ;;  %vm185_vm6 = vcmask 7168  }
  0x2f   :  { %v312_v5 = vpack.c.bf16 %v59_v3, %v58_v2  ;;  %v315_v7 = vpack.c.bf16 %v61_v6, %v60_v4  ;;  %v62_v8 = vld [vmem:[#allocation8 + $0x20] sm:$0xff]  ;;  %v63_v9 = vld [vmem:[#allocation8 + $0x28] sm:$0xff]  ;;  %v64_v11 = vld [vmem:[#allocation8 + $0x30] sm:$0xff]  ;;  %354 = vset.pattern.permute.xlu0 %v455_v27  ;;  %v153_v29 = vand.u32 127, %v152_v28  ;;  %v158_v43 = vshrl.u32 %v152_v28, 7 }
  0x30   :  { %v318_v10 = vpack.c.bf16 %v63_v9, %v62_v8  ;;  %v65_v12 = vld [vmem:[#allocation8 + $0x38] sm:$0xff]  ;;  %v66_v14 = vld [vmem:[#allocation8 + $0x40] sm:$0xff]  ;;  %v67_v15 = vld [vmem:[#allocation8 + $0x48] sm:$0xff] }
  0x31   :  { %313 = vmatpush3.bf16.msra.mxu0 %v312_v5  ;;  %v321_v13 = vpack.c.bf16 %v65_v12, %v64_v11  ;;  %v324_v16 = vpack.c.bf16 %v67_v15, %v66_v14  ;;  %v68_v17 = vld [vmem:[#allocation8 + $0x50] sm:$0xff]  ;;  %v69_v18 = vld [vmem:[#allocation8 + $0x58] sm:$0xff]  ;;  %v70_v20 = vld [vmem:[#allocation8 + $0x60] sm:$0xff]  ;;  %vm154_vm1 = vcmp.lt.s32.totalorder %v153_v29, 8  ;;  %vm161_vm4 = vcmp.lt.s32.totalorder %v158_v43, 2 }
  0x32   :  { %314 = vmatprep.subr.bf16.mxu0 %v452_v0  ;;  %v327_v19 = vpack.c.bf16 %v69_v18, %v68_v17  ;;  %v71_v21 = vld [vmem:[#allocation8 + $0x68] sm:$0xff]  ;;  %v72_v23 = vld [vmem:[#allocation8 + $0x70] sm:$0xff]  ;;  %v73_v24 = vld [vmem:[#allocation8 + $0x78] sm:$0xff] }
  0x33   :  { %v330_v22 = vpack.c.bf16 %v71_v21, %v70_v20  ;;  %v333_v25 = vpack.c.bf16 %v73_v24, %v72_v23  ;;  %v57_v26 = vld [vmem:[#allocation4] sm:$0xff] }
  0x34   :  { %v257_v30 = vld [vmem:[%s554_s2] ss:$0 sm:$0xff] }
  0x35   :  { %316 = vmatpush3.bf16.msra.mxu0 %v315_v7  ;;  %v155_v35 = vld [vmem:[%s555_s3] sm:$0xff] }
  0x36   :  { %317 = vmatprep.subr.bf16.mxu0 %v452_v0  ;;  %vm162_vm3 = vcmp.ge.s32.totalorder %v155_v35, 0 }
  0x37   :  { %vm163_vm5 = vmand %vm161_vm4, %vm162_vm3 }
  0x38   :  { %v258_v50 = vsel %vm163_vm5, 1.0, %v454_v1 }
  0x39   :  { %319 = vmatpush3.bf16.msra.mxu0 %v318_v10  ;;  %v202_v52 = vsel %vm185_vm6, %v258_v50, 0.0 }
  0x3a   :  { %320 = vmatprep.subr.bf16.mxu0 %v452_v0 }
  0x3d   :  { %322 = vmatpush3.bf16.msra.mxu0 %v321_v13 }
  0x3e   :  { %323 = vmatprep.subr.bf16.mxu0 %v452_v0 }
  0x41   :  { %325 = vmatpush3.bf16.msra.mxu0 %v324_v16 }
  0x42   :  { %326 = vmatprep.subr.bf16.mxu0 %v452_v0 }
  0x45   :  { %328 = vmatpush3.bf16.msra.mxu0 %v327_v19 }
  0x46   :  { %329 = vmatprep.subr.bf16.mxu0 %v452_v0 }
  0x49   :  { %331 = vmatpush3.bf16.msra.mxu0 %v330_v22 }
  0x4a   :  { %332 = vmatprep.subr.bf16.mxu0 %v452_v0 }
  0x4d   :  { %334 = vmatpush3.bf16.msra.mxu0 %v333_v25 }
  0x50   :  { %309 = vmatmul.mubr.f32.vlgmr.msra.gmra.mrb[0].mxu0 %v57_v26 }
 0x123   :  { %v147_v31 = vpop.f32.mrb[0].mxu0 }
 0x124   :  { %v148_v32 = vadd.f32 %v257_v30, %v147_v31  ;;  %v310_v33 = vpop.f32.mrb[1].mxu0 }
 0x126   :  { %151 = vst [vmem:[#allocation10] sm:$0xff] %v148_v32  ;;  %v164_v34 = vsel %vm154_vm1, %v148_v32, -inf }
 0x127   :  { %165 = vmax.xlane.f32.xlu0 %v164_v34 }
 0x13d   :  { %176 = vperm.xlu0 %354, %v155_v35  }
 0x1b4   :  { %v166_v36 = vpop.xlane.xlu0 %165 }
 0x1b5   :  { %v167_v37 = vsub.f32 %v164_v34, %v166_v36 }
 0x1b7   :  { %v168_v38 = vmul.f32 1.442695, %v167_v37 }
 0x1b9   :  { %355 = vpow2.f32 %v168_v38 }
 0x1bc   :  { %v177_v39 = vpop.permute.xlu0 %176 }
 0x1bd   :  { %vm178_vm2 = vcmp.eq.s32.totalorder %v153_v29, %v177_v39 }
 0x1be   :  { %v179_v41 = vsel %vm178_vm2, %v148_v32, 0.0 }
 0x1c3   :  { %v356_v40 = vpop.eup %355 }
 0x1c4   :  { %170 = vadd.xlane.f32.xlu1 %v356_v40 }
 0x1c8   :  { %180 = vadd.xlane.f32.xlu1 %v179_v41 }
 0x251   :  { %v171_v42 = vpop.xlane.xlu1 %170 }
 0x252   :  { %357 = vlog2.f32 %v171_v42 }
 0x255   :  { %v181_v47 = vpop.xlane.xlu1 %180 }
 0x25c   :  { %v358_v44 = vpop.eup %357 }
 0x25d   :  { %v173_v45 = vmul.f32 0.6931472, %v358_v44 }
 0x25f   :  { %v174_v46 = vadd.f32 %v173_v45, %v166_v36 }
 0x261   :  { %v182_v48 = vsub.f32 %v174_v46, %v181_v47 }
 0x263   :  { %v183_v49 = vsel %vm163_vm5, %v182_v48, 0.0 }
 0x264   :  { %v186_v51 = vsel %vm185_vm6, %v183_v49, 0.0 }
 0x265   :  { %187 = vadd.xlane.f32.xlu1 %v186_v51 }
 0x269   :  { %203 = vadd.xlane.f32.xlu1 %v202_v52 }
 0x2f2   :  { %v188_v53 = vpop.xlane.xlu1 %187 }
 0x2f3   :  { %v189_v54 = vrot.slane %v188_v53, 4 }
 0x2f5   :  { %v190_v55 = vadd.f32 %v189_v54, %v188_v53 }
 0x2f6   :  { %v204_v56 = vpop.xlane.xlu1 %203 }
 0x2f7   :  { %v191_v57 = vrot.slane %v190_v55, 2  ;;  %v205_v58 = vrot.slane %v204_v56, 4 }
 0x2f9   :  { %v206_v59 = vadd.f32 %v205_v58, %v204_v56  ;;  %v192_v60 = vadd.f32 %v191_v57, %v190_v55 }
 0x2fb   :  { %v207_v61 = vrot.slane %v206_v59, 2  ;;  %v193_v62 = vrot.slane %v192_v60, 1 }
 0x2fd   :  { %v208_v63 = vadd.f32 %v207_v61, %v206_v59  ;;  %v194_v0 = vadd.f32 %v193_v62, %v192_v60 }
 0x2ff   :  { %335 = vpush %v194_v0  ;;  %v209_v2 = vrot.slane %v208_v63, 1 }
 0x301   :  { %v210_v3 = vadd.f32 %v209_v2, %v208_v63 }
 0x303   :  { %337 = vpush %v210_v3 }
 0x330   :  { %s336_s2 = spop %335 }
 0x334   :  { %s338_s3 = spop %337 }
 0x335   :  { %v220_v1 = vstv %s338_s3 }
 0x336   :  { %359 = vrcp.f32 %v220_v1 }
 0x340   :  { %v360_v4 = vpop.eup %359 }
 0x341   :  { %339 = vpush %v360_v4 }
 0x372   :  { %s340_s28 = spop %339 }
 0x373   :  { %s223_s29 = smul.f32 %s340_s28, %s336_s2 }
 0x375   :  { %225 = sst [smem:[#allocation11]] %s223_s29 }
 0x376   :  { %230 = vsyncadd [#allocation6], 96  ;;  %s456_s30 = smov [#allocation10]  }
 0x377   :  { %s231_s6 = sshll.u32 %s456_s30, 4  ;;  %s232_s6 = int_to_ptr.vmem [resolvable:$true] %s231_s6 }
 0x378   :  { %s405_s7 = scalar_lea.vmem %s232_s6, 32  ;;  %s409_s10 = scalar_lea.vmem %s232_s6, 128 }
 0x379   :  { %p406_p4 = scmp.ne.s32.totalorder %s232_s6, %s405_s7  ;;  %p410_p5 = scmp.lt.s32.totalorder %s232_s6, %s232_s6 }
 0x37a   :  { %p411_p6 = scmp.lt.s32.totalorder %s409_s10, %s405_s7 }
 0x37c   :  { %p412_p7 = por %p411_p6, %p410_p5 }
 0x37e   :  { %p413_p8 = pnand %p412_p7, %p406_p4 }
 0x380   :  { %416 = shalt.err (!%p413_p8)
}
 0x381   :  { %s417_s13 = scalar_lea.hbm %s556_s4, 32 }
 0x382   :  { %p418_p9 = scmp.ne.s32.totalorder %s556_s4, %s417_s13  ;;  %p421_p10 = scmp.lt.u32.totalorder %s417_s13, %s556_s4 }
 0x384   :  { %p423_p11 = pnand %p421_p10, %p418_p9 }
 0x386   :  { %426 = shalt.err (!%p423_p11)
}
 0x387   :  { %237 = dma.vmem_to_hbm [thread:$0]  %s232_s6, 32, %s556_s4, [#allocation6], %s447_s8, %s447_s8, %s448_s9  }
 0x388   :  { %s427_s0 = scalar_lea.hbm %s557_s5, 16 }
 0x389   :  { %p428_p12 = scmp.ne.s32.totalorder %s557_s5, %s427_s0  ;;  %p431_p13 = scmp.lt.u32.totalorder %s427_s0, %s557_s5 }
 0x38b   :  { %p433_p0 = pnand %p431_p13, %p428_p12 }
 0x38d   :  { %436 = shalt.err (!%p433_p0)
}
 0x38e   :  { %s457_s25 = smov [#allocation11]  }
 0x38f   :  { %245 = dma.smem_to_hbm %s457_s25, 16, %s557_s5, [#allocation7]  }
 0x390   :  { %441 = dma.done.wait [#allocation6], 128  }
 0x391   :  { %442 = vsyncadd [#allocation6], 4294967168 }
 0x392   :  { %443 = dma.done.wait [#allocation7], 16  }
 0x393   :  { %444 = vsyncadd [#allocation7], 4294967280 }
 0x394   :  { %252 = sfence }
 0x395   :  { %253 = vsyncpa [#allocation5], 1 }
 0x396   :  { %254 = vsyncpa [#allocation9], 1 }
 0x397   :  { %255 = vsyncpa [#allocation6], 1 }
 0x398   :  { %256 = vsyncpa [#allocation7], 1 }

</bundles_post_ra>
